<compile_context>
chip_gen: v7x
topology: tpu7x:2x2x1
jax: 0.10.0
libtpu: 0.0.40
codegen_flags: <defaults>
</compile_context>

<pallas_src>
import functools

import jax
import jax.numpy as jnp
from jax.experimental import pallas as pl
from jax.experimental.pallas import tpu as pltpu

# Keep (2 double-buffered policy blocks + ~4 live (TB, A) f32 temporaries)
# comfortably inside v7x VMEM:  ~6 * TB*A * 4B <= ~12 MiB.
_MAX_TILE_ELEMS = 512 * 1024
_VMEM_LIMIT_BYTES = 32 * 1024 * 1024


def _ac_loss_kernel(policy_ref, action_ref, td_ref, value_ref, r_ref, out_ref,
                    *, entropy_beta, tile_b, steps_per_core):
    c = pl.program_id(0)              # parallel (per-TensorCore) axis
    j = pl.program_id(1)              # batch-tile reduction axis

    # Output block is resident across the reduction axis: use it as the
    # accumulator directly.
    @pl.when(j == 0)
    def _init():
        out_ref[...] = jnp.zeros_like(out_ref)

    # value_loss = 0.25 * sum((value - r)^2), folded in exactly once.
    @pl.when(jnp.logical_and(c == 0, j == 0))
    def _value_loss():
        diff = value_ref[...] - r_ref[...]                        # (B, 1)
        out_ref[...] += 0.25 * jnp.sum(diff * diff, keepdims=True)

    # ---- policy term for this (TB, A) tile --------------------------------
    policy = policy_ref[...].astype(jnp.float32)                  # (TB, A)
    m = jnp.max(policy, axis=1, keepdims=True)                    # (TB, 1)
    shifted = policy - m
    e = jnp.exp(shifted)                                          # (TB, A) EUP
    denom = jnp.sum(e, axis=1, keepdims=True)                     # (TB, 1)
    log_sm = shifted - jnp.log(denom)                             # (TB, A)
    sm = e * pl.reciprocal(denom, approx=False)                   # (TB, A)

    # Rows of this tile inside the VMEM-resident O(B) tensors.
    row0 = pl.multiple_of((c * steps_per_core + j) * tile_b, tile_b)
    td = td_ref[pl.ds(row0, tile_b), :]                           # (TB, 1)
    act = action_ref[pl.ds(row0, tile_b), :]                      # (TB, 1) i32

    # Fused:  sum_i [ nll_i*td_i - beta*entropy_i ]
    #       = sum_{i,a} log_sm * (beta*sm - td*onehot)
    col = jax.lax.broadcasted_iota(jnp.int32, policy.shape, 1)    # (TB, A)
    weight = entropy_beta * sm - jnp.where(col == act, td, jnp.float32(0.0))
    out_ref[...] += jnp.sum(log_sm * weight, keepdims=True)       # (1, 1)


def _choose_tile_b(B, A):
    """Largest batch tile that divides B, is sublane-aligned, and fits VMEM."""
    if B * A <= _MAX_TILE_ELEMS:
        return B
    cap = max(8, (_MAX_TILE_ELEMS // max(A, 1)) // 8 * 8)
    tb = min(cap, (B // 8) * 8)
    while tb >= 8:
        if B % tb == 0:
            return tb
        tb -= 8
    # TODO(synk): handle batch sizes with no aligned divisor via a masked
    # partial last tile instead of falling back to the whole array.
    return B


def actor_critic_loss(policy, value, action_taken, temporary_difference, r,
                      entropy_beta):
    """Fused actor-critic loss. Returns a scalar (0-d) float32."""
    B, A = policy.shape

    value_2d = jnp.reshape(value, (B, 1)).astype(jnp.float32)
    r_2d = jnp.reshape(r, (B, 1)).astype(jnp.float32)
    action_2d = jnp.reshape(action_taken, (B, 1)).astype(jnp.int32)
    td_2d = jnp.reshape(temporary_difference, (B, 1)).astype(jnp.float32)

    tile_b = _choose_tile_b(B, A)
    steps = B // tile_b
    n_cores = 2 if (steps >= 2 and steps % 2 == 0) else 1
    steps_per_core = steps // n_cores

    kernel = functools.partial(
        _ac_loss_kernel,
        entropy_beta=float(entropy_beta),
        tile_b=tile_b,
        steps_per_core=steps_per_core,
    )

    resident = pl.BlockSpec((B, 1), lambda c, j: (0, 0))          # DMA'd once
    cost = pl.CostEstimate(
        flops=10 * B * A,
        transcendentals=B * A + 2 * B,
        bytes_accessed=B * A * policy.dtype.itemsize + 16 * B + 4 * n_cores,
    )

    partials = pl.pallas_call(
        kernel,
        grid=(n_cores, steps_per_core),
        in_specs=[
            pl.BlockSpec((tile_b, A),
                         lambda c, j: (c * steps_per_core + j, 0)),  # policy
            resident,                                                # action
            resident,                                                # td
            resident,                                                # value
            resident,                                                # r
        ],
        out_specs=pl.BlockSpec((1, 1), lambda c, j: (c, 0)),
        out_shape=jax.ShapeDtypeStruct((n_cores, 1), jnp.float32),
        compiler_params=pltpu.CompilerParams(
            dimension_semantics=("parallel", "arbitrary"),
            vmem_limit_bytes=_VMEM_LIMIT_BYTES,
        ),
        cost_estimate=cost,
    )(policy, action_2d, td_2d, value_2d, r_2d)

    return jnp.sum(partials)


def reference_loss(policy, value, action_taken, td, r, entropy_beta):
    """Pure-JAX reference mirroring the PyTorch module."""
    policy_f = policy.astype(jnp.float32)
    log_sm = jax.nn.log_softmax(policy_f, axis=1)
    sm = jax.nn.softmax(policy_f, axis=1)
    entropy = -jnp.sum(sm * log_sm, axis=1)
    nll = -jnp.take_along_axis(log_sm, action_taken[:, None], axis=1)[:, 0]
    policy_loss = jnp.sum(nll * td - entropy * entropy_beta)
    value_loss = 0.25 * jnp.sum((jnp.ravel(value) - jnp.ravel(r)) ** 2)
    return value_loss + policy_loss


if __name__ == "__main__":
    entropy_beta = 0.01

    def make_inputs(key, batch, actions):
        kp, kv, ka, kt, kr = jax.random.split(key, 5)
        policy = jax.random.normal(kp, (batch, actions), jnp.float32)
        value = jax.random.normal(kv, (batch,), jnp.float32)
        action = jax.random.randint(ka, (batch,), 0, actions, dtype=jnp.int32)
        td = jax.random.normal(kt, (batch,), jnp.float32)
        r = jax.random.normal(kr, (batch,), jnp.float32)
        return policy, value, action, td, r

    key = jax.random.PRNGKey(0)
    k_small, k_big = jax.random.split(key)

    # Small shapes consistent with the module (batch=2, actions=4).
    args = make_inputs(k_small, 2, 4)
    loss = actor_critic_loss(*args, entropy_beta)
    jax.block_until_ready(loss)
    ref = reference_loss(*args, entropy_beta)
    assert loss.shape == ()
    assert jnp.allclose(loss, ref, atol=1e-5, rtol=1e-5), (loss, ref)

    # Larger shape to exercise the multi-step / 2-core tiled path.
    args_big = make_inputs(k_big, 2048, 512)
    loss_big = actor_critic_loss(*args_big, entropy_beta)
    jax.block_until_ready(loss_big)
    ref_big = reference_loss(*args_big, entropy_beta)
    assert jnp.allclose(loss_big, ref_big, rtol=1e-3, atol=1e-2), (loss_big, ref_big)

    print("KERNEL_OK")
</pallas_src>

<mosaic_0001>
module attributes {stable_mosaic.version = 11 : i64} {
  func.func @_ac_loss_kernel(%arg0: i32, %arg1: i32, %arg2: memref<2x4xf32, #tpu.memory_space<vmem>>, %arg3: memref<2x1xi32, #tpu.memory_space<vmem>>, %arg4: memref<2x1xf32, #tpu.memory_space<vmem>>, %arg5: memref<2x1xf32, #tpu.memory_space<vmem>>, %arg6: memref<2x1xf32, #tpu.memory_space<vmem>>, %arg7: memref<1x1xf32, #tpu.memory_space<vmem>>) attributes {dimension_semantics = [#tpu.dimension_semantics<parallel>, #tpu.dimension_semantics<arbitrary>], iteration_bounds = array<i64: 1, 1>, scalar_prefetch = 0 : i64, scratch_operands = 0 : i64, tpu.core_type = #tpu.core_type<tc>, window_params = [{transform_indices = @transform_0, window_bounds = array<i64: 2, 4>}, {pipeline_mode = #tpu.pipeline_mode<synchronous>, transform_indices = @transform_1, window_bounds = array<i64: 2, 1>}, {pipeline_mode = #tpu.pipeline_mode<synchronous>, transform_indices = @transform_2, window_bounds = array<i64: 2, 1>}, {pipeline_mode = #tpu.pipeline_mode<synchronous>, transform_indices = @transform_3, window_bounds = array<i64: 2, 1>}, {pipeline_mode = #tpu.pipeline_mode<synchronous>, transform_indices = @transform_4, window_bounds = array<i64: 2, 1>}, {transform_indices = @transform_5, window_bounds = array<i64: 1, 1>}]} {
    %c0_i32 = arith.constant 0 : i32
    %0 = arith.cmpi eq, %arg1, %c0_i32 : i32
    %1 = arith.extui %0 : i1 to i32
    %c0_i32_0 = arith.constant 0 : i32
    %2 = arith.cmpi ne, %1, %c0_i32_0 : i32
    scf.if %2 {
      %cst_15 = arith.constant 0.000000e+00 : f32
      %49 = vector.broadcast %cst_15 : f32 to vector<1x1xf32>
      %c0_16 = arith.constant 0 : index
      %c0_17 = arith.constant 0 : index
      %50 = vector.load %arg7[%c0_16, %c0_17] : memref<1x1xf32, #tpu.memory_space<vmem>>, vector<1x1xf32>
      tpu.vector_store %arg7[%c0_16, %c0_17], %49 {strides = array<i32>} : memref<1x1xf32, #tpu.memory_space<vmem>>, vector<1x1xf32>,
    } else {
    }
    %c0_i32_1 = arith.constant 0 : i32
    %3 = arith.cmpi eq, %arg0, %c0_i32_1 : i32
    %c0_i32_2 = arith.constant 0 : i32
    %4 = arith.cmpi eq, %arg1, %c0_i32_2 : i32
    %5 = arith.andi %3, %4 : i1
    %6 = arith.extui %5 : i1 to i32
    %c0_i32_3 = arith.constant 0 : i32
    %7 = arith.cmpi ne, %6, %c0_i32_3 : i32
    scf.if %7 {
      %c0_15 = arith.constant 0 : index
      %c0_16 = arith.constant 0 : index
      %49 = vector.load %arg5[%c0_15, %c0_16] : memref<2x1xf32, #tpu.memory_space<vmem>>, vector<2x1xf32>
      %c0_17 = arith.constant 0 : index
      %c0_18 = arith.constant 0 : index
      %50 = vector.load %arg6[%c0_17, %c0_18] : memref<2x1xf32, #tpu.memory_space<vmem>>, vector<2x1xf32>
      %51 = arith.subf %49, %50 : vector<2x1xf32>
      %c0_19 = arith.constant 0 : index
      %c0_20 = arith.constant 0 : index
      %52 = vector.load %arg7[%c0_19, %c0_20] : memref<1x1xf32, #tpu.memory_space<vmem>>, vector<1x1xf32>
      %53 = arith.mulf %51, %51 : vector<2x1xf32>
      %54 = vector.shape_cast %53 : vector<2x1xf32> to vector<1x2x1xf32>
      %cst_21 = arith.constant dense<0.000000e+00> : vector<1xf32>
      %55 = vector.multi_reduction <add>, %54, %cst_21 [1, 2] : vector<1x2x1xf32> to vector<1xf32>
      %56 = vector.shape_cast %55 : vector<1xf32> to vector<1x1x1xf32>
      %57 = vector.extract %56[0, 0, 0] : f32 from vector<1x1x1xf32>
      %58 = vector.broadcast %57 : f32 to vector<1x1xf32>
      %cst_22 = arith.constant 2.500000e-01 : f32
      %59 = vector.broadcast %cst_22 : f32 to vector<1x1xf32>
      %60 = arith.mulf %59, %58 : vector<1x1xf32>
      %61 = arith.addf %52, %60 : vector<1x1xf32>
      %c0_23 = arith.constant 0 : index
      %c0_24 = arith.constant 0 : index
      %62 = vector.load %arg7[%c0_23, %c0_24] : memref<1x1xf32, #tpu.memory_space<vmem>>, vector<1x1xf32>
      tpu.vector_store %arg7[%c0_23, %c0_24], %61 {strides = array<i32>} : memref<1x1xf32, #tpu.memory_space<vmem>>, vector<1x1xf32>,
    } else {
    }
    %c0 = arith.constant 0 : index
    %c0_4 = arith.constant 0 : index
    %8 = vector.load %arg2[%c0, %c0_4] : memref<2x4xf32, #tpu.memory_space<vmem>>, vector<2x4xf32>
    %cst = arith.constant dense<0xFF800000> : vector<2xf32>
    %9 = vector.multi_reduction <maximumf>, %8, %cst [1] : vector<2x4xf32> to vector<2xf32>
    %10 = vector.shape_cast %9 : vector<2xf32> to vector<2x1xf32>
    %11 = vector.broadcast %10 : vector<2x1xf32> to vector<2x4xf32>
    %12 = arith.subf %8, %11 : vector<2x4xf32>
    %13 = math.exp %12 : vector<2x4xf32>
    %cst_5 = arith.constant dense<0.000000e+00> : vector<2xf32>
    %14 = vector.multi_reduction <add>, %13, %cst_5 [1] : vector<2x4xf32> to vector<2xf32>
    %15 = vector.shape_cast %14 : vector<2xf32> to vector<2x1xf32>
    %16 = math.log %15 : vector<2x1xf32>
    %17 = vector.broadcast %16 : vector<2x1xf32> to vector<2x4xf32>
    %18 = arith.subf %12, %17 : vector<2x4xf32>
    %19 = tpu.reciprocal %15 : vector<2x1xf32> -> vector<2x1xf32>
    %20 = vector.broadcast %19 : vector<2x1xf32> to vector<2x4xf32>
    %21 = arith.mulf %13, %20 : vector<2x4xf32>
    %c1_i32 = arith.constant 1 : i32
    %22 = arith.muli %arg0, %c1_i32 : i32
    %23 = arith.addi %22, %arg1 : i32
    %c2_i32 = arith.constant 2 : i32
    %24 = arith.muli %23, %c2_i32 : i32
    %25 = tpu.assume_multiple %24, 2 : i32
    %26 = arith.index_cast %25 : i32 to index
    %c0_6 = arith.constant 0 : index
    %27 = vector.load %arg4[%26, %c0_6] : memref<2x1xf32, #tpu.memory_space<vmem>>, vector<2x1xf32>
    %28 = arith.index_cast %25 : i32 to index
    %c0_7 = arith.constant 0 : index
    %29 = vector.load %arg3[%28, %c0_7] : memref<2x1xi32, #tpu.memory_space<vmem>>, vector<2x1xi32>
    %30 = tpu.iota {dimensions = array<i32: 1>} : vector<2x4xi32>
    %cst_8 = arith.constant 0.00999999977 : f32
    %31 = vector.broadcast %cst_8 : f32 to vector<2x4xf32>
    %32 = arith.mulf %31, %21 : vector<2x4xf32>
    %33 = vector.broadcast %29 : vector<2x1xi32> to vector<2x4xi32>
    %34 = arith.cmpi eq, %30, %33 : vector<2x4xi32>
    %cst_9 = arith.constant 0.000000e+00 : f32
    %35 = vector.shape_cast %27 : vector<2x1xf32> to vector<2x1xf32>
    %36 = vector.broadcast %35 : vector<2x1xf32> to vector<2x4xf32>
    %37 = vector.broadcast %cst_9 : f32 to vector<2x4xf32>
    %38 = arith.select %34, %36, %37 : vector<2x4xi1>, vector<2x4xf32>
    %39 = arith.subf %32, %38 : vector<2x4xf32>
    %c0_10 = arith.constant 0 : index
    %c0_11 = arith.constant 0 : index
    %40 = vector.load %arg7[%c0_10, %c0_11] : memref<1x1xf32, #tpu.memory_space<vmem>>, vector<1x1xf32>
    %41 = arith.mulf %18, %39 : vector<2x4xf32>
    %42 = vector.shape_cast %41 : vector<2x4xf32> to vector<1x2x4xf32>
    %cst_12 = arith.constant dense<0.000000e+00> : vector<1xf32>
    %43 = vector.multi_reduction <add>, %42, %cst_12 [1, 2] : vector<1x2x4xf32> to vector<1xf32>
    %44 = vector.shape_cast %43 : vector<1xf32> to vector<1x1x1xf32>
    %45 = vector.extract %44[0, 0, 0] : f32 from vector<1x1x1xf32>
    %46 = vector.broadcast %45 : f32 to vector<1x1xf32>
    %47 = arith.addf %40, %46 : vector<1x1xf32>
    %c0_13 = arith.constant 0 : index
    %c0_14 = arith.constant 0 : index
    %48 = vector.load %arg7[%c0_13, %c0_14] : memref<1x1xf32, #tpu.memory_space<vmem>>, vector<1x1xf32>
    tpu.vector_store %arg7[%c0_13, %c0_14], %47 {strides = array<i32>} : memref<1x1xf32, #tpu.memory_space<vmem>>, vector<1x1xf32>,
    return
  }
  func.func @transform_0(%arg0: i32, %arg1: i32) -> (i32, i32) {
    %c1_i32 = arith.constant 1 : i32
    %0 = arith.muli %arg0, %c1_i32 : i32
    %1 = arith.addi %0, %arg1 : i32
    %c0_i32 = arith.constant 0 : i32
    %c0_i32_0 = arith.constant 0 : i32
    return %1, %c0_i32 : i32, i32
  }
  func.func @transform_1(%arg0: i32, %arg1: i32) -> (i32, i32) {
    %c0_i32 = arith.constant 0 : i32
    %c0_i32_0 = arith.constant 0 : i32
    %c0_i32_1 = arith.constant 0 : i32
    return %c0_i32, %c0_i32_0 : i32, i32
  }
  func.func @transform_2(%arg0: i32, %arg1: i32) -> (i32, i32) {
    %c0_i32 = arith.constant 0 : i32
    %c0_i32_0 = arith.constant 0 : i32
    %c0_i32_1 = arith.constant 0 : i32
    return %c0_i32, %c0_i32_0 : i32, i32
  }
  func.func @transform_3(%arg0: i32, %arg1: i32) -> (i32, i32) {
    %c0_i32 = arith.constant 0 : i32
    %c0_i32_0 = arith.constant 0 : i32
    %c0_i32_1 = arith.constant 0 : i32
    return %c0_i32, %c0_i32_0 : i32, i32
  }
  func.func @transform_4(%arg0: i32, %arg1: i32) -> (i32, i32) {
    %c0_i32 = arith.constant 0 : i32
    %c0_i32_0 = arith.constant 0 : i32
    %c0_i32_1 = arith.constant 0 : i32
    return %c0_i32, %c0_i32_0 : i32, i32
  }
  func.func @transform_5(%arg0: i32, %arg1: i32) -> (i32, i32) {
    %c0_i32 = arith.constant 0 : i32
    %c0_i32_0 = arith.constant 0 : i32
    return %arg0, %c0_i32 : i32, i32
  }
}

</mosaic_0001>

<bundles_post_ra>
// kernel: tpu_custom_call.1
= control target key start
LH: loop header
LB: loop body
LE: loop exit
PB: predicated region body
PF: predicated region fallthrough
CT: control target
= control target key end

     0   :  { %vm71_vm0 = vcmask 25600   ;;  %s247_s0 = inlined_call_operand.vmem [shape: f32[2,4], index: 0, kind: input, shape index: {}]   ;;  %s248_s1 = inlined_call_operand.vmem [shape: s32[2,1], index: 1, kind: input, shape index: {}]   ;;  %s249_s2 = inlined_call_operand.vmem [shape: f32[2,1], index: 2, kind: input, shape index: {}]   ;;  %s250_s3 = inlined_call_operand.vmem [shape: f32[2,1], index: 3, kind: input, shape index: {}]   ;;  %s251_s4 = inlined_call_operand.vmem [shape: f32[2,1], index: 4, kind: input, shape index: {}]   ;;  %s252_s5 = inlined_call_operand.hbm [shape: f32[1,1], index: 5, kind: output, shape index: {}]  }
   0x1   :  { %v70_v0 = vld [vmem:[%s247_s0] sm:$0x3] }
   0x2   :  { %10 = vsyncpa [#allocation3], 0  ;;  %v72_v1 = vsel %vm71_vm0, %v70_v0, -inf  ;;  %v91_v2 = vld [vmem:[%s248_s1] sm:$0x3]  ;;  %v181_v3 = vmov 0   ;;  %v92_v16 = vlaneseq }
   0x3   :  { %73 = vmax.xlane.f32.xlu0 %v72_v1  ;;  %149 = vset.pattern.permute.xlu1 %v181_v3  ;;  %v89_v4 = vld [vmem:[%s249_s2] sm:$0x3]  ;;  %vm54_vm1 = vcmask 1024   ;;  %vm42_vm3 = vcmask 0   ;;  %v182_v37 = vmov 0.0  }
   0x4   :  { %150 = vset.pattern.permute.xlu0 %v181_v3  ;;  %96 = vperm.xlu1 %149, %v91_v2   ;;  %v49_v10 = vld [vmem:[%s250_s3] sm:$0x3]  ;;  %v93_v18 = vand.u32 127, %v92_v16  ;;  %43 = vst.msk [vmem:[#allocation2] sm:$0x1] %vm42_vm3, %v182_v37  ;;  %s183_s3 = smov [#allocation2]  }
   0x5   :  { %v50_v11 = vld [vmem:[%s251_s4] sm:$0x3]  ;;  %s128_s4 = sshll.u32 %s183_s3, 4  ;;  %s129_s4 = int_to_ptr.vmem [resolvable:$true] %s128_s4 }
   0x6   :  { %v51_v12 = vsub.f32 %v49_v10, %v50_v11  ;;  %s157_s27 = scalar_lea.vmem %s129_s4, 16  ;;  %s161_s28 = scalar_lea.vmem %s129_s4, 32 }
   0x7   :  { %p158_p0 = scmp.ne.s32.totalorder %s129_s4, %s157_s27  ;;  %p162_p1 = scmp.lt.s32.totalorder %s129_s4, %s129_s4 }
   0x8   :  { %101 = vperm.xlu1 %149, %v89_v4   ;;  %v53_v13 = vmul.f32 %v51_v12, %v51_v12  ;;  %p163_p2 = scmp.lt.s32.totalorder %s161_s28, %s157_s27 }
   0xa   :  { %v55_v14 = vsel %vm54_vm1, %v53_v13, 0.0  ;;  %p164_p3 = por %p163_p2, %p162_p1 }
   0xb   :  { %v52_v38 = vld [vmem:[#allocation2] sm:$0x1] }
   0xc   :  { %p165_p4 = pnand %p164_p3, %p158_p0 }
  0x83   :  { %v97_v17 = vpop.permute.xlu1 %96 }
  0x84   :  { %vm98_vm2 = vcmp.eq.s32.totalorder %v93_v18, %v97_v17 }
  0x87   :  { %v102_v22 = vpop.permute.xlu1 %101 }
  0x88   :  { %v104_v25 = vsel %vm98_vm2, %v102_v22, 0.0 }
  0x90   :  { %v74_v5 = vpop.xlane.xlu0 %73 }
  0x91   :  { %v75_v6 = vsub.f32 %v70_v0, %v74_v5 }
  0x93   :  { %v76_v7 = vmul.f32 1.442695, %v75_v6 }
  0x95   :  { %151 = vpow2.f32 %v76_v7 }
  0x9f   :  { %v152_v8 = vpop.eup %151 }
  0xa0   :  { %v78_v9 = vsel %vm71_vm0, %v152_v8, 0.0 }
  0xa1   :  { %79 = vadd.xlane.f32.xlu0 %v78_v9 }
  0xa5   :  { %56 = vadd.xlane.f32.xlu0 %v55_v14 }
 0x12e   :  { %v80_v15 = vpop.xlane.xlu0 %79 }
 0x12f   :  { %153 = vlog2.f32 %v80_v15 }
 0x130   :  { %155 = vrcp.f32 %v80_v15 }
 0x132   :  { %v57_v28 = vpop.xlane.xlu0 %56 }
 0x133   :  { %v58_v29 = vrot.slane %v57_v28, 4 }
 0x135   :  { %v59_v31 = vadd.f32 %v58_v29, %v57_v28 }
 0x137   :  { %v60_v33 = vrot.slane %v59_v31, 2 }
 0x139   :  { %v154_v19 = vpop.eup %153  ;;  %v61_v34 = vadd.f32 %v60_v33, %v59_v31 }
 0x13a   :  { %v156_v20 = vpop.eup %155  ;;  %v82_v21 = vmul.f32 0.6931472, %v154_v19 }
 0x13b   :  { %v85_v23 = vmul.f32 %v156_v20, %v152_v8  ;;  %v62_v35 = vrot.slane %v61_v34, 1 }
 0x13c   :  { %v83_v27 = vsub.f32 %v75_v6, %v82_v21 }
 0x13d   :  { %v94_v24 = vmul.f32 0.01, %v85_v23  ;;  %v63_v36 = vadd.f32 %v62_v35, %v61_v34 }
 0x13f   :  { %v105_v26 = vsub.f32 %v94_v24, %v104_v25  ;;  %142 = vpush %v63_v36 }
 0x141   :  { %v107_v30 = vmul.f32 %v105_v26, %v83_v27 }
 0x143   :  { %v108_v32 = vsel %vm71_vm0, %v107_v30, 0.0 }
 0x144   :  { %109 = vadd.xlane.f32.xlu1 %v108_v32 }
 0x170   :  { %s143_s2 = spop %142 }
 0x171   :  { %v65_v39 = vstv %s143_s2 }
 0x172   :  { %v66_v40 = vmul.f32 0.25, %v65_v39 }
 0x174   :  { %v67_v41 = vadd.f32 %v66_v40, %v52_v38 }
 0x176   :  { %69 = vst.msk [vmem:[#allocation2] sm:$0x1] %vm42_vm3, %v67_v41 }
 0x17d   :  { %v106_v49 = vld [vmem:[#allocation2] sm:$0x1] }
 0x1d1   :  { %v110_v42 = vpop.xlane.xlu1 %109 }
 0x1d2   :  { %v111_v43 = vrot.slane %v110_v42, 4 }
 0x1d4   :  { %v112_v44 = vadd.f32 %v111_v43, %v110_v42 }
 0x1d6   :  { %v113_v45 = vrot.slane %v112_v44, 2 }
 0x1d8   :  { %v114_v46 = vadd.f32 %v113_v45, %v112_v44 }
 0x1da   :  { %v115_v47 = vrot.slane %v114_v46, 1 }
 0x1dc   :  { %v116_v48 = vadd.f32 %v115_v47, %v114_v46 }
 0x1de   :  { %144 = vpush %v116_v48 }
 0x20f   :  { %s145_s26 = spop %144 }
 0x210   :  { %v118_v50 = vstv %s145_s26 }
 0x211   :  { %v119_v51 = vadd.f32 %v118_v50, %v106_v49 }
 0x213   :  { %121 = vst.msk [vmem:[#allocation2] sm:$0x1] %vm42_vm3, %v119_v51 }
 0x214   :  { %168 = shalt.err (!%p165_p4)
}
 0x215   :  { %s169_s6 = scalar_lea.hbm %s252_s5, 16 }
 0x216   :  { %p170_p5 = scmp.ne.s32.totalorder %s252_s5, %s169_s6  ;;  %p173_p6 = scmp.lt.u32.totalorder %s169_s6, %s252_s5 }
 0x218   :  { %p175_p7 = pnand %p173_p6, %p170_p5 }
 0x21a   :  { %178 = shalt.err (!%p175_p7)
}
 0x21b   :  { %131 = dma.vmem_to_hbm [thread:$0]  %s129_s4, 16, %s252_s5, [#allocation3]  }
 0x21c   :  { %179 = dma.done.wait [#allocation3], 16  }
 0x21d   :  { %180 = vsyncadd [#allocation3], 4294967280 }
 0x21e   :  { %135 = vsyncpa [#allocation3], 1 }

</bundles_post_ra>
